<compile_context>
chip_gen: v5e
topology: v5e:2x2
jax: 0.10.0
libtpu: 0.0.40
codegen_flags: <defaults>
</compile_context>

<pallas_src>
import jax
import jax.numpy as jnp
from jax import lax
from jax.experimental import pallas as pl
from jax.experimental.pallas import tpu as pltpu


def _round_up(x: int, m: int) -> int:
    return (x + m - 1) // m * m


def _item_mf_kernel(emb_ref, ix_ref, iy_ref, coef_ref, o_ref):
    # emb_ref : [F, n_aid]   VMEM-resident transposed embedding table
    # ix_ref  : [1, TB]      int32 indices, batch on lanes
    # iy_ref  : [1, TB]      int32 indices, batch on lanes
    # coef_ref: [1, TB]      f32  coef_x * coef_y
    # o_ref   : [1, TB]      f32  lane-dense output tile
    n_aid = emb_ref.shape[1]
    tb = ix_ref.shape[1]

    emb = emb_ref[...]                                          # [F, n_aid]

    # One-hot gather via MXU: onehot[a, b] = (a == idx[b]).
    row = lax.broadcasted_iota(jnp.int32, (n_aid, tb), 0)       # [n_aid, TB]
    oh_x = (row == ix_ref[...]).astype(emb.dtype)               # [n_aid, TB]
    oh_y = (row == iy_ref[...]).astype(emb.dtype)               # [n_aid, TB]

    ex = jnp.dot(emb, oh_x, preferred_element_type=jnp.float32)  # [F, TB]
    ey = jnp.dot(emb, oh_y, preferred_element_type=jnp.float32)  # [F, TB]

    # Dot product over factors: sublane reduce -> [1, TB] (lane-dense).
    dot = jnp.sum(ex * ey, axis=0, keepdims=True)
    o_ref[...] = (dot * coef_ref[...]).astype(o_ref.dtype)


def item_mf_forward(emb_table, aid_x, aid_y, coef_x, coef_y, *, block_b=None):
    """Pallas implementation of ItemMFModel.forward."""
    n_aid, n_factors = emb_table.shape
    B = aid_x.shape[0]

    # One-time layout plumbing: factors on sublanes, aids on lanes.
    emb_t = emb_table.T.astype(jnp.float32)                     # [F, n_aid]

    # Batch tile size: lane-multiple, large enough to amortize per-step cost.
    if block_b is None:
        block_b = min(1024, _round_up(max(B, 1), 128))
    Bp = _round_up(B, block_b)
    pad = Bp - B

    ix = jnp.pad(aid_x.astype(jnp.int32), (0, pad)).reshape(1, Bp)
    iy = jnp.pad(aid_y.astype(jnp.int32), (0, pad)).reshape(1, Bp)
    coef = coef_x.astype(jnp.float32) * coef_y.astype(jnp.float32)
    coef = jnp.pad(coef, (0, pad)).reshape(1, Bp)

    grid = (Bp // block_b,)

    # VMEM budget: resident table + a few double-buffered [1, TB] tiles.
    table_bytes = n_factors * n_aid * 4
    need = table_bytes + 8 * block_b * 4 * 2 + (4 << 20)
    vmem_limit = None if need <= (32 << 20) else int(min(need, 100 << 20))

    out = pl.pallas_call(
        _item_mf_kernel,
        out_shape=jax.ShapeDtypeStruct((1, Bp), jnp.float32),
        grid_spec=pltpu.PrefetchScalarGridSpec(
            num_scalar_prefetch=0,
            grid=grid,
            in_specs=[
                # Full-array block, constant index -> fetched once, stays resident.
                pl.BlockSpec((n_factors, n_aid), lambda i: (0, 0)),
                pl.BlockSpec((1, block_b), lambda i: (0, i)),
                pl.BlockSpec((1, block_b), lambda i: (0, i)),
                pl.BlockSpec((1, block_b), lambda i: (0, i)),
            ],
            out_specs=pl.BlockSpec((1, block_b), lambda i: (0, i)),
        ),
        compiler_params=pltpu.CompilerParams(
            dimension_semantics=("parallel",),
            vmem_limit_bytes=vmem_limit,
        ),
    )(emb_t, ix, iy, coef)

    return out[0, :B]                                            # [B]


def init_item_mf_params(key, n_aid, n_factors):
    """Deterministic init matching nn.init.uniform_(-1/n_factors, 1/n_factors)."""
    initrange = 1.0 / n_factors
    return jax.random.uniform(
        key, (n_aid, n_factors), dtype=jnp.float32,
        minval=-initrange, maxval=initrange,
    )


if __name__ == "__main__":
    n_aid, n_factors, batch = 64, 32, 8

    key = jax.random.PRNGKey(0)
    k_emb, k_x, k_y, k_cx, k_cy = jax.random.split(key, 5)

    emb_table = init_item_mf_params(k_emb, n_aid, n_factors)
    aid_x = jax.random.randint(k_x, (batch,), 0, n_aid, dtype=jnp.int32)
    aid_y = jax.random.randint(k_y, (batch,), 0, n_aid, dtype=jnp.int32)
    coef_x = jax.random.uniform(k_cx, (batch,), dtype=jnp.float32)
    coef_y = jax.random.uniform(k_cy, (batch,), dtype=jnp.float32)

    out = item_mf_forward(emb_table, aid_x, aid_y, coef_x, coef_y)
    out = jax.block_until_ready(out)

    # Reference check (plain JAX).
    ref = (jnp.take(emb_table, aid_x, axis=0)
           * jnp.take(emb_table, aid_y, axis=0)).sum(axis=1) * coef_x * coef_y
    assert out.shape == (batch,)
    assert jnp.allclose(out, ref, atol=1e-6, rtol=1e-5), (out, ref)

    print("KERNEL_OK")
</pallas_src>

<mosaic_0001>
module attributes {stable_mosaic.version = 11 : i64} {
  func.func @_item_mf_kernel(%arg0: i32, %arg1: memref<32x64xf32, #tpu.memory_space<vmem>>, %arg2: memref<1x128xi32, #tpu.memory_space<vmem>>, %arg3: memref<1x128xi32, #tpu.memory_space<vmem>>, %arg4: memref<1x128xf32, #tpu.memory_space<vmem>>, %arg5: memref<1x128xf32, #tpu.memory_space<vmem>>) attributes {dimension_semantics = [#tpu.dimension_semantics<parallel>], iteration_bounds = array<i64: 1>, scalar_prefetch = 0 : i64, scratch_operands = 0 : i64, tpu.core_type = #tpu.core_type<tc>, window_params = [{pipeline_mode = #tpu.pipeline_mode<synchronous>, transform_indices = @transform_0, window_bounds = array<i64: 32, 64>}, {transform_indices = @transform_1, window_bounds = array<i64: 1, 128>}, {transform_indices = @transform_2, window_bounds = array<i64: 1, 128>}, {transform_indices = @transform_3, window_bounds = array<i64: 1, 128>}, {transform_indices = @transform_4, window_bounds = array<i64: 1, 128>}]} {
    %c0 = arith.constant 0 : index
    %c0_0 = arith.constant 0 : index
    %0 = vector.load %arg1[%c0, %c0_0] : memref<32x64xf32, #tpu.memory_space<vmem>>, vector<32x64xf32>
    %1 = tpu.iota {dimensions = array<i32: 0>} : vector<64x128xi32>
    %c0_1 = arith.constant 0 : index
    %c0_2 = arith.constant 0 : index
    %2 = vector.load %arg2[%c0_1, %c0_2] : memref<1x128xi32, #tpu.memory_space<vmem>>, vector<1x128xi32>
    %3 = vector.broadcast %2 : vector<1x128xi32> to vector<64x128xi32>
    %4 = arith.cmpi eq, %1, %3 : vector<64x128xi32>
    %5 = arith.extui %4 : vector<64x128xi1> to vector<64x128xi32>
    %6 = arith.sitofp %5 : vector<64x128xi32> to vector<64x128xf32>
    %c0_3 = arith.constant 0 : index
    %c0_4 = arith.constant 0 : index
    %7 = vector.load %arg3[%c0_3, %c0_4] : memref<1x128xi32, #tpu.memory_space<vmem>>, vector<1x128xi32>
    %8 = vector.broadcast %7 : vector<1x128xi32> to vector<64x128xi32>
    %9 = arith.cmpi eq, %1, %8 : vector<64x128xi32>
    %10 = arith.extui %9 : vector<64x128xi1> to vector<64x128xi32>
    %11 = arith.sitofp %10 : vector<64x128xi32> to vector<64x128xf32>
    %cst = arith.constant dense<0.000000e+00> : vector<32x128xf32>
    %12 = tpu.matmul %0, %6, %cst {dimension_numbers = #tpu.dot_dimension_numbers<[1], [0], [0], [1], [0, 0, 1, 1], [], []>} : vector<32x64xf32>, vector<64x128xf32>, vector<32x128xf32> -> vector<32x128xf32>
    %cst_5 = arith.constant dense<0.000000e+00> : vector<32x128xf32>
    %13 = tpu.matmul %0, %11, %cst_5 {dimension_numbers = #tpu.dot_dimension_numbers<[1], [0], [0], [1], [0, 0, 1, 1], [], []>} : vector<32x64xf32>, vector<64x128xf32>, vector<32x128xf32> -> vector<32x128xf32>
    %14 = arith.mulf %12, %13 : vector<32x128xf32>
    %cst_6 = arith.constant dense<0.000000e+00> : vector<128xf32>
    %15 = vector.multi_reduction <add>, %14, %cst_6 [0] : vector<32x128xf32> to vector<128xf32>
    %16 = vector.shape_cast %15 : vector<128xf32> to vector<1x128xf32>
    %c0_7 = arith.constant 0 : index
    %c0_8 = arith.constant 0 : index
    %17 = vector.load %arg4[%c0_7, %c0_8] : memref<1x128xf32, #tpu.memory_space<vmem>>, vector<1x128xf32>
    %18 = arith.mulf %16, %17 : vector<1x128xf32>
    %c0_9 = arith.constant 0 : index
    %c0_10 = arith.constant 0 : index
    %19 = vector.load %arg5[%c0_9, %c0_10] : memref<1x128xf32, #tpu.memory_space<vmem>>, vector<1x128xf32>
    tpu.vector_store %arg5[%c0_9, %c0_10], %18 {strides = array<i32>} : memref<1x128xf32, #tpu.memory_space<vmem>>, vector<1x128xf32>,
    return
  }
  func.func @transform_0(%arg0: i32) -> (i32, i32) {
    %c0_i32 = arith.constant 0 : i32
    %c0_i32_0 = arith.constant 0 : i32
    %c0_i32_1 = arith.constant 0 : i32
    return %c0_i32, %c0_i32_0 : i32, i32
  }
  func.func @transform_1(%arg0: i32) -> (i32, i32) {
    %c0_i32 = arith.constant 0 : i32
    %c0_i32_0 = arith.constant 0 : i32
    return %c0_i32, %arg0 : i32, i32
  }
  func.func @transform_2(%arg0: i32) -> (i32, i32) {
    %c0_i32 = arith.constant 0 : i32
    %c0_i32_0 = arith.constant 0 : i32
    return %c0_i32, %arg0 : i32, i32
  }
  func.func @transform_3(%arg0: i32) -> (i32, i32) {
    %c0_i32 = arith.constant 0 : i32
    %c0_i32_0 = arith.constant 0 : i32
    return %c0_i32, %arg0 : i32, i32
  }
  func.func @transform_4(%arg0: i32) -> (i32, i32) {
    %c0_i32 = arith.constant 0 : i32
    %c0_i32_0 = arith.constant 0 : i32
    return %c0_i32, %arg0 : i32, i32
  }
}

</mosaic_0001>

<bundles_post_ra>
// kernel: tpu_custom_call.1
= control target key start
LH: loop header
LB: loop body
LE: loop exit
PB: predicated region body
PF: predicated region fallthrough
CT: control target
= control target key end

     0   :  { %9 = vsyncpa [#allocation3], 0  ;;  %s406_s0 = inlined_call_operand.hbm [shape: f32[32,64], index: 0, kind: input, shape index: {}]   ;;  %s407_s1 = inlined_call_operand.hbm [shape: s32[1,128], index: 1, kind: input, shape index: {}]   ;;  %s408_s2 = inlined_call_operand.vmem [shape: s32[1,128], index: 2, kind: input, shape index: {}]   ;;  %s409_s3 = inlined_call_operand.vmem [shape: f32[1,128], index: 3, kind: input, shape index: {}]   ;;  %s410_s4 = inlined_call_operand.hbm [shape: f32[1,128], index: 4, kind: output, shape index: {}]  }
   0x1   :  { %10 = vsyncpa [#allocation6], 0 }
   0x2   :  { %11 = vsyncpa [#allocation4], 0  ;;  %s16_s17 = sshll.u32 %s406_s0, 4  ;;  %s360_s18 = smov [#allocation2]   ;;  %s17_s17 = int_to_ptr.hbm [resolvable:$true] %s16_s17 }
   0x3   :  { %s18_s19 = sshll.u32 %s360_s18, 4  ;;  %s30_s22 = sshll.u32 %s407_s1, 4  ;;  %s19_s19 = int_to_ptr.vmem [resolvable:$true] %s18_s19  ;;  %s31_s22 = int_to_ptr.hbm [resolvable:$true] %s30_s22 }
   0x4   :  { %s361_s23 = smov 128   ;;  %s362_s24 = smov 8  }
   0x5   :  { %24 = dma.hbm_to_vmem [thread:$0]  %s17_s17, 512, %s19_s19, [#allocation3], %s361_s23, %s361_s23, %s362_s24  }
   0x6   :  { %s363_s25 = smov [#allocation5]  }
   0x7   :  { %s32_s26 = sshll.u32 %s363_s25, 4  ;;  %s33_s26 = int_to_ptr.vmem [resolvable:$true] %s32_s26 }
   0x8   :  { %35 = dma.hbm_to_vmem [thread:$0]  %s31_s22, 16, %s33_s26, [#allocation6]  }
   0x9   :  { %354 = dma.done.wait [#allocation3], 512  }
   0xa   :  { %355 = vsyncadd [#allocation3], 4294966784 }
   0xb   :  { %356 = dma.done.wait [#allocation6], 16  }
   0xc   :  { %357 = vsyncadd [#allocation6], 4294967280  ;;  %v52_v0 = vlaneseq  ;;  %v280_v5 = vld [vmem:[#allocation5] ss:$0 sm:$0xff]  ;;  %v364_v8 = vmov 1.0   ;;  %v50_v13 = vld [vmem:[#allocation2 + $0x10] sm:$0xff] }
   0xd   :  { %v281_v6 = vld [vmem:[%s408_s2] ss:$0 sm:$0xff]  ;;  %v49_v14 = vld [vmem:[#allocation2 + $0x8] sm:$0xff]  ;;  %v51_v15 = vld [vmem:[#allocation2 + $0x18] sm:$0xff]  ;;  %s365_s28 = smov [#allocation7]   ;;  %s207_s6 = sshll.u32 %s410_s4, 4  ;;  %s208_s6 = int_to_ptr.hbm [resolvable:$true] %s207_s6 }
   0xe   :  { %v53_v1 = vshrl.u32 %v52_v0, 7  ;;  %v48_v12 = vld [vmem:[#allocation2] sm:$0xff]  ;;  %s205_s29 = sshll.u32 %s365_s28, 4  ;;  %s206_s29 = int_to_ptr.vmem [resolvable:$true] %s205_s29 }
   0xf   :  { %v197_v36 = vld [vmem:[%s409_s3] sm:$0x1] }
  0x10   :  { %v60_v2 = vadd.s32 56, %v53_v1  ;;  %v59_v3 = vadd.s32 48, %v53_v1  ;;  %v58_v4 = vadd.s32 40, %v53_v1  ;;  %v57_v7 = vadd.s32 32, %v53_v1 }
  0x11   :  { %v56_v9 = vadd.s32 24, %v53_v1  ;;  %v55_v10 = vadd.s32 16, %v53_v1  ;;  %v54_v11 = vadd.s32 8, %v53_v1  ;;  %vm63_vm14 = vcmp.eq.s32.totalorder %v53_v1, %v280_v5 }
  0x12   :  { %vm70_vm0 = vcmp.eq.s32.totalorder %v60_v2, %v280_v5  ;;  %vm69_vm1 = vcmp.eq.s32.totalorder %v59_v3, %v280_v5  ;;  %vm96_vm2 = vcmp.eq.s32.totalorder %v60_v2, %v281_v6  ;;  %vm95_vm3 = vcmp.eq.s32.totalorder %v59_v3, %v281_v6 }
  0x13   :  { %234 = vmatpush.msk.msra.mxu0 %vm70_vm0, %v364_v8  ;;  %258 = vmatpush.msk.msra.mxu2 %vm70_vm0, %v364_v8  ;;  %vm68_vm4 = vcmp.eq.s32.totalorder %v58_v4, %v280_v5  ;;  %vm94_vm5 = vcmp.eq.s32.totalorder %v58_v4, %v281_v6  ;;  %vm67_vm6 = vcmp.eq.s32.totalorder %v57_v7, %v280_v5  ;;  %vm113_vm0 = vcmask 523264  }
  0x14   :  { %246 = vmatpush.msk.msra.mxu1 %vm96_vm2, %v364_v8  ;;  %266 = vmatpush.msk.msra.mxu3 %vm96_vm2, %v364_v8  ;;  %vm93_vm7 = vcmp.eq.s32.totalorder %v57_v7, %v281_v6  ;;  %vm66_vm8 = vcmp.eq.s32.totalorder %v56_v9, %v280_v5  ;;  %vm92_vm9 = vcmp.eq.s32.totalorder %v56_v9, %v281_v6 }
  0x15   :  { %235 = vmatpush.msk.msra.mxu0 %vm69_vm1, %v364_v8  ;;  %259 = vmatpush.msk.msra.mxu2 %vm69_vm1, %v364_v8  ;;  %vm65_vm10 = vcmp.eq.s32.totalorder %v55_v10, %v280_v5  ;;  %vm91_vm11 = vcmp.eq.s32.totalorder %v55_v10, %v281_v6  ;;  %vm64_vm12 = vcmp.eq.s32.totalorder %v54_v11, %v280_v5 }
  0x16   :  { %247 = vmatpush.msk.msra.mxu1 %vm95_vm3, %v364_v8  ;;  %267 = vmatpush.msk.msra.mxu3 %vm95_vm3, %v364_v8  ;;  %vm90_vm13 = vcmp.eq.s32.totalorder %v54_v11, %v281_v6  ;;  %vm89_vm15 = vcmp.eq.s32.totalorder %v53_v1, %v281_v6 }
  0x17   :  { %236 = vmatpush.msk.msra.mxu0 %vm68_vm4, %v364_v8  ;;  %260 = vmatpush.msk.msra.mxu2 %vm68_vm4, %v364_v8 }
  0x18   :  { %248 = vmatpush.msk.msra.mxu1 %vm94_vm5, %v364_v8  ;;  %268 = vmatpush.msk.msra.mxu3 %vm94_vm5, %v364_v8 }
  0x19   :  { %237 = vmatpush.msk.msra.mxu0 %vm67_vm6, %v364_v8  ;;  %261 = vmatpush.msk.msra.mxu2 %vm67_vm6, %v364_v8 }
  0x1a   :  { %249 = vmatpush.msk.msra.mxu1 %vm93_vm7, %v364_v8  ;;  %269 = vmatpush.msk.msra.mxu3 %vm93_vm7, %v364_v8 }
  0x1b   :  { %238 = vmatpush.msk.msra.mxu0 %vm66_vm8, %v364_v8  ;;  %262 = vmatpush.msk.msra.mxu2 %vm66_vm8, %v364_v8 }
  0x1c   :  { %250 = vmatpush.msk.msra.mxu1 %vm92_vm9, %v364_v8  ;;  %270 = vmatpush.msk.msra.mxu3 %vm92_vm9, %v364_v8 }
  0x1d   :  { %239 = vmatpush.msk.msra.mxu0 %vm65_vm10, %v364_v8  ;;  %263 = vmatpush.msk.msra.mxu2 %vm65_vm10, %v364_v8 }
  0x1e   :  { %251 = vmatpush.msk.msra.mxu1 %vm91_vm11, %v364_v8  ;;  %271 = vmatpush.msk.msra.mxu3 %vm91_vm11, %v364_v8 }
  0x1f   :  { %240 = vmatpush.msk.msra.mxu0 %vm64_vm12, %v364_v8  ;;  %264 = vmatpush.msk.msra.mxu2 %vm64_vm12, %v364_v8 }
  0x20   :  { %252 = vmatpush.msk.msra.mxu1 %vm90_vm13, %v364_v8  ;;  %272 = vmatpush.msk.msra.mxu3 %vm90_vm13, %v364_v8 }
  0x21   :  { %241 = vmatpush.msk.msra.mxu0 %vm63_vm14, %v364_v8  ;;  %265 = vmatpush.msk.msra.mxu2 %vm63_vm14, %v364_v8 }
  0x22   :  { %253 = vmatpush.msk.msra.mxu1 %vm89_vm15, %v364_v8  ;;  %273 = vmatpush.msk.msra.mxu3 %vm89_vm15, %v364_v8 }
  0x23   :  { %242 = vmatmul.msk.f32.vlgmr.msra.gmra.mxu0 %vm113_vm0, %v48_v12  ;;  %244 = vmatmul.msk.f32.vlgmr.msra.gmra.mxu2 %vm113_vm0, %v50_v13 }
  0x24   :  { %254 = vmatmul.msk.f32.vlgmr.msra.gmra.mxu1 %vm113_vm0, %v48_v12  ;;  %256 = vmatmul.msk.f32.vlgmr.msra.gmra.mxu3 %vm113_vm0, %v50_v13 }
  0x2b   :  { %243 = vmatmul.msk.f32.gmra.mxu0 %vm113_vm0, %v49_v14  ;;  %245 = vmatmul.msk.f32.gmra.mxu2 %vm113_vm0, %v51_v15 }
  0x2c   :  { %255 = vmatmul.msk.f32.gmra.mxu1 %vm113_vm0, %v49_v14  ;;  %257 = vmatmul.msk.f32.gmra.mxu3 %vm113_vm0, %v51_v15 }
  0xa0   :  { %v143_v16 = vpop.f32.mrf.mxu0 }
  0xa1   :  { %v172_v17 = vpop.f32.mrf.mxu1 }
  0xa2   :  { %v184_v22 = vmul.f32 %v172_v17, %v143_v16 }
  0xa6   :  { %v149_v18 = vpop.f32.mrf.mxu2 }
  0xa7   :  { %v178_v19 = vpop.f32.mrf.mxu3 }
  0xa8   :  { %v146_v20 = vpop.f32.mrf.mxu0  ;;  %v186_v25 = vmul.f32 %v178_v19, %v149_v18 }
  0xa9   :  { %v175_v21 = vpop.f32.mrf.mxu1 }
  0xaa   :  { %v185_v23 = vmul.f32 %v175_v21, %v146_v20 }
  0xac   :  { %v188_v24 = vadd.f32 %v185_v23, %v184_v22 }
  0xae   :  { %v152_v26 = vpop.f32.mrf.mxu2  ;;  %v189_v29 = vadd.f32 %v188_v24, %v186_v25 }
  0xaf   :  { %v181_v27 = vpop.f32.mrf.mxu3 }
  0xb0   :  { %v187_v28 = vmul.f32 %v181_v27, %v152_v26 }
  0xb2   :  { %v190_v30 = vadd.f32 %v189_v29, %v187_v28 }
  0xb4   :  { %v191_v31 = vrot.slane %v190_v30, 4 }
  0xb6   :  { %v192_v32 = vadd.f32 %v191_v31, %v190_v30 }
  0xb8   :  { %v193_v33 = vrot.slane %v192_v32, 2 }
  0xba   :  { %v194_v34 = vadd.f32 %v193_v33, %v192_v32 }
  0xbc   :  { %v195_v35 = vrot.slane %v194_v34, 1 }
  0xbe   :  { %v196_v37 = vadd.f32 %v195_v35, %v194_v34 }
  0xc0   :  { %v198_v38 = vmul.f32 %v197_v36, %v196_v37 }
  0xc2   :  { %199 = vst [vmem:[#allocation7] sm:$0x1] %v198_v38 }
  0xc3   :  { %210 = dma.vmem_to_hbm [thread:$0]  %s206_s29, 16, %s208_s6, [#allocation4]  }
  0xc4   :  { %358 = dma.done.wait [#allocation4], 16  }
  0xc5   :  { %359 = vsyncadd [#allocation4], 4294967280 }
  0xc6   :  { %215 = vsyncpa [#allocation3], 1 }
  0xc7   :  { %216 = vsyncpa [#allocation6], 1 }
  0xc8   :  { %217 = vsyncpa [#allocation4], 1 }

</bundles_post_ra>
